<compile_context>
chip_gen: v5e
topology: v5e:2x2
jax: 0.10.0
libtpu: 0.0.40
codegen_flags: <defaults>
</compile_context>

<pallas_src>
import functools

import jax
import jax.numpy as jnp
from jax.experimental import pallas as pl
from jax.experimental.pallas import tpu as pltpu

_LANE = 128      # lane width (last dim)
_SUBLANE = 8     # sublane width (second-to-last dim)


def _round_up(n, m):
    return ((n + m - 1) // m) * m


def _cdiv(a, b):
    return -(-a // b)


def _pad_to(a, shape):
    pads = [(0, t - s) for s, t in zip(a.shape, shape)]
    if all(p == (0, 0) for p in pads):
        return a
    return jnp.pad(a, pads)


def _choose_block_b(B, max_block=512):
    """Smallest number of near-equal batch tiles, each <= max_block rows.

    >=2 tiles whenever B > 256 (keeps both v7x TensorCores busy and lets the x
    DMA pipeline behind compute); the last tile is nearly full (no ~2x padding
    for awkward batch sizes like B=520).
    """
    n_blocks = max(_cdiv(B, max_block), 2 if B > 256 else 1)
    return _round_up(_cdiv(B, n_blocks), _SUBLANE)


def ffnn_kernel(x_ref, w1_ref, b1_ref, w2_ref, b2_ref, w3_ref, b3_ref, o_ref):
    # Layer 1: bf16 MXU matmul with f32 accumulation; bias + ReLU in f32.
    h = jnp.dot(x_ref[...], w1_ref[...], preferred_element_type=jnp.float32)
    h = jnp.maximum(h + b1_ref[...], 0.0)
    # Layer 2.
    h = jnp.dot(h.astype(w2_ref.dtype), w2_ref[...],
                preferred_element_type=jnp.float32)
    h = jnp.maximum(h + b2_ref[...], 0.0)
    # Output layer (no activation); lane-dense (128-padded) store.
    out = jnp.dot(h.astype(w3_ref.dtype), w3_ref[...],
                  preferred_element_type=jnp.float32) + b3_ref[...]
    o_ref[...] = out.astype(o_ref.dtype)


def prepare_params(w1, b1, w2, b2, w3, b3, compute_dtype=jnp.bfloat16):
    """Pad H / C to lane multiples and cast weights to the MXU compute dtype.

    Call ONCE and cache the result; this keeps per-forward HBM traffic to the
    activations plus a single pass over the (already bf16) weights.
    Zero-padding is numerically exact for Linear(+ReLU).
    Weights must already be laid out as (in_features, out_features).
    """
    D_in, H = w1.shape
    C = w3.shape[1]
    Hp = _round_up(H, _LANE)
    Cp = _round_up(C, _LANE)

    w1p = _pad_to(w1, (D_in, Hp)).astype(compute_dtype)
    w2p = _pad_to(w2, (Hp, Hp)).astype(compute_dtype)
    w3p = _pad_to(w3, (Hp, Cp)).astype(compute_dtype)
    # Biases stay f32 (bias-add/ReLU run in f32 on all chip generations).
    b1p = _pad_to(b1.reshape(1, -1), (1, Hp)).astype(jnp.float32)
    b2p = _pad_to(b2.reshape(1, -1), (1, Hp)).astype(jnp.float32)
    b3p = _pad_to(b3.reshape(1, -1), (1, Cp)).astype(jnp.float32)
    return (w1p, b1p, w2p, b2p, w3p, b3p)


@functools.partial(jax.jit, static_argnames=("num_classes", "compute_dtype"))
def ffnn_forward(x, w1p, b1p, w2p, b2p, w3p, b3p, *, num_classes,
                 compute_dtype=jnp.bfloat16):
    """Fused FFNN forward. Params must come from prepare_params()."""
    B, D_in = x.shape
    Hp = w1p.shape[1]
    Cp = w3p.shape[1]
    out_dtype = x.dtype

    block_b = _choose_block_b(B)
    Bp = _round_up(B, block_b)
    grid = (Bp // block_b,)

    # Only the activation is padded/cast per call (it changes every call).
    xp = _pad_to(x, (Bp, D_in)).astype(compute_dtype)

    # Grid-invariant weights/biases: constant index_map + single buffering
    # (they are DMA'd exactly once; double-buffering them only wastes VMEM).
    def _wspec(shape):
        return pl.BlockSpec(shape, lambda i: (0, 0),
                            pipeline_mode=pl.Buffered(1))

    in_specs = [
        pl.BlockSpec((block_b, D_in), lambda i: (i, 0)),   # x (batch-tiled)
        _wspec((D_in, Hp)),                                # w1
        _wspec((1, Hp)),                                   # b1
        _wspec((Hp, Hp)),                                  # w2
        _wspec((1, Hp)),                                   # b2
        _wspec((Hp, Cp)),                                  # w3
        _wspec((1, Cp)),                                   # b3
    ]
    out_spec = pl.BlockSpec((block_b, Cp), lambda i: (i, 0))

    cdt_bytes = jnp.dtype(compute_dtype).itemsize
    out_bytes = jnp.dtype(out_dtype).itemsize
    weight_bytes = (D_in * Hp + Hp * Hp + Hp * Cp) * cdt_bytes
    bias_bytes = (2 * Hp + Cp) * 4

    # VMEM budget: 2x x-tile + 2x out-tile (double-buffered), single-buffered
    # weights/biases, plus f32 (block_b, Hp) intermediates / compiler scratch.
    vmem_needed = (
        2 * block_b * D_in * cdt_bytes
        + 2 * block_b * Cp * out_bytes
        + weight_bytes + bias_bytes
        + 2 * block_b * Hp * 4
    )
    vmem_limit = int(min(max(2 * vmem_needed, 32 * 2**20), 100 * 2**20))

    flops = 2 * Bp * (D_in * Hp + Hp * Hp + Hp * Cp)
    bytes_accessed = int(
        Bp * D_in * cdt_bytes          # x read
        + weight_bytes + bias_bytes    # weights read once
        + Bp * Cp * out_bytes          # output write
    )

    outp = pl.pallas_call(
        ffnn_kernel,
        out_shape=jax.ShapeDtypeStruct((Bp, Cp), out_dtype),
        grid_spec=pltpu.PrefetchScalarGridSpec(
            num_scalar_prefetch=0,
            grid=grid,
            in_specs=in_specs,
            out_specs=out_spec,
        ),
        compiler_params=pltpu.CompilerParams(
            dimension_semantics=("parallel",),
            vmem_limit_bytes=vmem_limit,
        ),
        cost_estimate=pl.CostEstimate(
            flops=flops, transcendentals=0, bytes_accessed=bytes_accessed),
    )(xp, w1p, b1p, w2p, b2p, w3p, b3p)

    # Slice off padded batch rows and padded class columns.
    return outp[:B, :num_classes]


def init_linear_params(key, in_features, out_features, dtype=jnp.float32):
    """PyTorch-style nn.Linear init: U(-1/sqrt(in), 1/sqrt(in)).
    Weight returned already transposed to (in_features, out_features)."""
    k_w, k_b = jax.random.split(key)
    bound = 1.0 / jnp.sqrt(in_features)
    w = jax.random.uniform(k_w, (in_features, out_features), dtype, -bound, bound)
    b = jax.random.uniform(k_b, (1, out_features), dtype, -bound, bound)
    return w, b


def ffnn_reference(x, w1, b1, w2, b2, w3, b3):
    h = jnp.maximum(x @ w1 + b1, 0.0)
    h = jnp.maximum(h @ w2 + b2, 0.0)
    return h @ w3 + b3


if __name__ == "__main__":
    # Small shapes consistent with the module's forward: x is (batch, input_size).
    batch, input_size, hidden_size, num_classes = 128, 32, 64, 16

    key = jax.random.PRNGKey(0)
    k_x, k1, k2, k3 = jax.random.split(key, 4)

    x = jax.random.normal(k_x, (batch, input_size), jnp.float32)
    w1, b1 = init_linear_params(k1, input_size, hidden_size)
    w2, b2 = init_linear_params(k2, hidden_size, hidden_size)
    w3, b3 = init_linear_params(k3, hidden_size, num_classes)

    # One-time parameter preparation (pad + bf16 cast), cached outside the
    # per-call path.
    params = prepare_params(w1, b1, w2, b2, w3, b3)
    params = tuple(jax.block_until_ready(p) for p in params)

    out = ffnn_forward(x, *params, num_classes=num_classes)
    out = jax.block_until_ready(out)

    ref = ffnn_reference(x, w1, b1, w2, b2, w3, b3)
    assert out.shape == (batch, num_classes)
    max_err = float(jnp.max(jnp.abs(out - ref)))
    # bf16 MXU operands with f32 accumulation -> loosened tolerance.
    assert jnp.allclose(out, ref, atol=3e-2, rtol=3e-2), (
        f"mismatch vs JAX reference (max abs err = {max_err})")

    print("KERNEL_OK")
</pallas_src>

<mosaic_0001>
module attributes {stable_mosaic.version = 11 : i64} {
  func.func @ffnn_kernel(%arg0: i32, %arg1: memref<128x32xbf16, #tpu.memory_space<vmem>>, %arg2: memref<32x128xbf16, #tpu.memory_space<vmem>>, %arg3: memref<1x128xf32, #tpu.memory_space<vmem>>, %arg4: memref<128x128xbf16, #tpu.memory_space<vmem>>, %arg5: memref<1x128xf32, #tpu.memory_space<vmem>>, %arg6: memref<128x128xbf16, #tpu.memory_space<vmem>>, %arg7: memref<1x128xf32, #tpu.memory_space<vmem>>, %arg8: memref<128x128xf32, #tpu.memory_space<vmem>>) attributes {dimension_semantics = [#tpu.dimension_semantics<parallel>], iteration_bounds = array<i64: 1>, scalar_prefetch = 0 : i64, scratch_operands = 0 : i64, tpu.core_type = #tpu.core_type<tc>, window_params = [{transform_indices = @transform_0, window_bounds = array<i64: 128, 32>}, {pipeline_mode = #tpu.pipeline_mode<synchronous>, transform_indices = @transform_1, window_bounds = array<i64: 32, 128>}, {pipeline_mode = #tpu.pipeline_mode<synchronous>, transform_indices = @transform_2, window_bounds = array<i64: 1, 128>}, {pipeline_mode = #tpu.pipeline_mode<synchronous>, transform_indices = @transform_3, window_bounds = array<i64: 128, 128>}, {pipeline_mode = #tpu.pipeline_mode<synchronous>, transform_indices = @transform_4, window_bounds = array<i64: 1, 128>}, {pipeline_mode = #tpu.pipeline_mode<synchronous>, transform_indices = @transform_5, window_bounds = array<i64: 128, 128>}, {pipeline_mode = #tpu.pipeline_mode<synchronous>, transform_indices = @transform_6, window_bounds = array<i64: 1, 128>}, {transform_indices = @transform_7, window_bounds = array<i64: 128, 128>}]} {
    %c0 = arith.constant 0 : index
    %c0_0 = arith.constant 0 : index
    %0 = vector.load %arg1[%c0, %c0_0] : memref<128x32xbf16, #tpu.memory_space<vmem>>, vector<128x32xbf16>
    %c0_1 = arith.constant 0 : index
    %c0_2 = arith.constant 0 : index
    %1 = vector.load %arg2[%c0_1, %c0_2] : memref<32x128xbf16, #tpu.memory_space<vmem>>, vector<32x128xbf16>
    %cst = arith.constant dense<0.000000e+00> : vector<128x128xf32>
    %2 = tpu.matmul %0, %1, %cst {dimension_numbers = #tpu.dot_dimension_numbers<[1], [0], [0], [1], [0, 0, 1, 1], [], []>} : vector<128x32xbf16>, vector<32x128xbf16>, vector<128x128xf32> -> vector<128x128xf32>
    %c0_3 = arith.constant 0 : index
    %c0_4 = arith.constant 0 : index
    %3 = vector.load %arg3[%c0_3, %c0_4] : memref<1x128xf32, #tpu.memory_space<vmem>>, vector<1x128xf32>
    %4 = vector.broadcast %3 : vector<1x128xf32> to vector<128x128xf32>
    %5 = arith.addf %2, %4 : vector<128x128xf32>
    %cst_5 = arith.constant 0.000000e+00 : f32
    %6 = vector.broadcast %cst_5 : f32 to vector<128x128xf32>
    %7 = arith.maximumf %5, %6 : vector<128x128xf32>
    %8 = arith.truncf %7 : vector<128x128xf32> to vector<128x128xbf16>
    %c0_6 = arith.constant 0 : index
    %c0_7 = arith.constant 0 : index
    %9 = vector.load %arg4[%c0_6, %c0_7] : memref<128x128xbf16, #tpu.memory_space<vmem>>, vector<128x128xbf16>
    %cst_8 = arith.constant dense<0.000000e+00> : vector<128x128xf32>
    %10 = tpu.matmul %8, %9, %cst_8 {dimension_numbers = #tpu.dot_dimension_numbers<[1], [0], [0], [1], [0, 0, 1, 1], [], []>} : vector<128x128xbf16>, vector<128x128xbf16>, vector<128x128xf32> -> vector<128x128xf32>
    %c0_9 = arith.constant 0 : index
    %c0_10 = arith.constant 0 : index
    %11 = vector.load %arg5[%c0_9, %c0_10] : memref<1x128xf32, #tpu.memory_space<vmem>>, vector<1x128xf32>
    %12 = vector.broadcast %11 : vector<1x128xf32> to vector<128x128xf32>
    %13 = arith.addf %10, %12 : vector<128x128xf32>
    %cst_11 = arith.constant 0.000000e+00 : f32
    %14 = vector.broadcast %cst_11 : f32 to vector<128x128xf32>
    %15 = arith.maximumf %13, %14 : vector<128x128xf32>
    %16 = arith.truncf %15 : vector<128x128xf32> to vector<128x128xbf16>
    %c0_12 = arith.constant 0 : index
    %c0_13 = arith.constant 0 : index
    %17 = vector.load %arg6[%c0_12, %c0_13] : memref<128x128xbf16, #tpu.memory_space<vmem>>, vector<128x128xbf16>
    %cst_14 = arith.constant dense<0.000000e+00> : vector<128x128xf32>
    %18 = tpu.matmul %16, %17, %cst_14 {dimension_numbers = #tpu.dot_dimension_numbers<[1], [0], [0], [1], [0, 0, 1, 1], [], []>} : vector<128x128xbf16>, vector<128x128xbf16>, vector<128x128xf32> -> vector<128x128xf32>
    %c0_15 = arith.constant 0 : index
    %c0_16 = arith.constant 0 : index
    %19 = vector.load %arg7[%c0_15, %c0_16] : memref<1x128xf32, #tpu.memory_space<vmem>>, vector<1x128xf32>
    %20 = vector.broadcast %19 : vector<1x128xf32> to vector<128x128xf32>
    %21 = arith.addf %18, %20 : vector<128x128xf32>
    %c0_17 = arith.constant 0 : index
    %c0_18 = arith.constant 0 : index
    %22 = vector.load %arg8[%c0_17, %c0_18] : memref<128x128xf32, #tpu.memory_space<vmem>>, vector<128x128xf32>
    tpu.vector_store %arg8[%c0_17, %c0_18], %21 {strides = array<i32>} : memref<128x128xf32, #tpu.memory_space<vmem>>, vector<128x128xf32>,
    return
  }
  func.func @transform_0(%arg0: i32) -> (i32, i32) {
    %c0_i32 = arith.constant 0 : i32
    %c0_i32_0 = arith.constant 0 : i32
    return %arg0, %c0_i32 : i32, i32
  }
  func.func @transform_1(%arg0: i32) -> (i32, i32) {
    %c0_i32 = arith.constant 0 : i32
    %c0_i32_0 = arith.constant 0 : i32
    %c0_i32_1 = arith.constant 0 : i32
    return %c0_i32, %c0_i32_0 : i32, i32
  }
  func.func @transform_2(%arg0: i32) -> (i32, i32) {
    %c0_i32 = arith.constant 0 : i32
    %c0_i32_0 = arith.constant 0 : i32
    %c0_i32_1 = arith.constant 0 : i32
    return %c0_i32, %c0_i32_0 : i32, i32
  }
  func.func @transform_3(%arg0: i32) -> (i32, i32) {
    %c0_i32 = arith.constant 0 : i32
    %c0_i32_0 = arith.constant 0 : i32
    %c0_i32_1 = arith.constant 0 : i32
    return %c0_i32, %c0_i32_0 : i32, i32
  }
  func.func @transform_4(%arg0: i32) -> (i32, i32) {
    %c0_i32 = arith.constant 0 : i32
    %c0_i32_0 = arith.constant 0 : i32
    %c0_i32_1 = arith.constant 0 : i32
    return %c0_i32, %c0_i32_0 : i32, i32
  }
  func.func @transform_5(%arg0: i32) -> (i32, i32) {
    %c0_i32 = arith.constant 0 : i32
    %c0_i32_0 = arith.constant 0 : i32
    %c0_i32_1 = arith.constant 0 : i32
    return %c0_i32, %c0_i32_0 : i32, i32
  }
  func.func @transform_6(%arg0: i32) -> (i32, i32) {
    %c0_i32 = arith.constant 0 : i32
    %c0_i32_0 = arith.constant 0 : i32
    %c0_i32_1 = arith.constant 0 : i32
    return %c0_i32, %c0_i32_0 : i32, i32
  }
  func.func @transform_7(%arg0: i32) -> (i32, i32) {
    %c0_i32 = arith.constant 0 : i32
    %c0_i32_0 = arith.constant 0 : i32
    return %arg0, %c0_i32 : i32, i32
  }
}

</mosaic_0001>

<bundles_post_ra>
// kernel: ffnn_forward.1
= control target key start
LH: loop header
LB: loop body
LE: loop exit
PB: predicated region body
PF: predicated region fallthrough
CT: control target
= control target key end

     0   :  { %12 = vsyncpa [#allocation3], 0  ;;  %s682_s27 = smov [#allocation2]   ;;  %s683_s29 = smov 64   ;;  %s883_s0 = inlined_call_operand.vmem [shape: bf16[128,32], index: 0, kind: input, shape index: {}]   ;;  %s884_s1 = inlined_call_operand.hbm [shape: bf16[32,128], index: 1, kind: input, shape index: {}]   ;;  %s885_s2 = inlined_call_operand.vmem [shape: f32[1,128], index: 2, kind: input, shape index: {}]   ;;  %s886_s3 = inlined_call_operand.vmem [shape: bf16[128,128], index: 3, kind: input, shape index: {}]   ;;  %s887_s4 = inlined_call_operand.vmem [shape: f32[1,128], index: 4, kind: input, shape index: {}]   ;;  %s888_s5 = inlined_call_operand.vmem [shape: bf16[128,128], index: 5, kind: input, shape index: {}]   ;;  %s889_s6 = inlined_call_operand.vmem [shape: f32[1,128], index: 6, kind: input, shape index: {}]   ;;  %s890_s7 = inlined_call_operand.vmem [shape: f32[128,128], index: 7, kind: output, shape index: {}]  }
   0x1   :  { %s19_s26 = sshll.u32 %s884_s1, 4  ;;  %s21_s28 = sshll.u32 %s682_s27, 4  ;;  %s20_s26 = int_to_ptr.hbm [resolvable:$true] %s19_s26  ;;  %s22_s28 = int_to_ptr.vmem [resolvable:$true] %s21_s28 }
   0x2   :  { %s684_s30 = smov 4  }
   0x3   :  { %27 = dma.hbm_to_vmem [thread:$0]  %s20_s26, 256, %s22_s28, [#allocation3], %s683_s29, %s683_s29, %s684_s30  }
   0x4   :  { %680 = dma.done.wait [#allocation3], 256  }
   0x5   :  { %681 = vsyncadd [#allocation3], 4294967040  ;;  %v617_v0 = vld [vmem:[#allocation2 + $0x8] sm:$0xff]  ;;  %v616_v1 = vld [vmem:[#allocation2] sm:$0xff]  ;;  %vm119_vm0 = vcmask 261120  }
   0x6   :  { %150 = vmatpush.bf16.msra.mxu0 %v617_v0  ;;  %v608_v2 = vld [vmem:[%s883_s0] sm:$0xff]  ;;  %v609_v3 = vld [vmem:[%s883_s0 + $0x8] sm:$0xff]  ;;  %v610_v4 = vld [vmem:[%s883_s0 + $0x10] sm:$0xff] }
   0x7   :  { %v611_v5 = vld [vmem:[%s883_s0 + $0x18] sm:$0xff]  ;;  %v612_v6 = vld [vmem:[%s883_s0 + $0x20] sm:$0xff]  ;;  %v613_v8 = vld [vmem:[%s883_s0 + $0x28] sm:$0xff] }
   0x8   :  { %v625_v7 = vld [vmem:[%s886_s3 + $0x38] sm:$0xff]  ;;  %v624_v9 = vld [vmem:[%s886_s3 + $0x30] sm:$0xff]  ;;  %v623_v10 = vld [vmem:[%s886_s3 + $0x28] sm:$0xff] }
   0x9   :  { %285 = vmatpush.bf16.msra.mxu1 %v625_v7  ;;  %634 = vmatpush.bf16.msra.mxu3 %v625_v7  ;;  %v622_v11 = vld [vmem:[%s886_s3 + $0x20] sm:$0xff]  ;;  %v621_v12 = vld [vmem:[%s886_s3 + $0x18] sm:$0xff]  ;;  %v614_v13 = vld [vmem:[%s883_s0 + $0x30] sm:$0xff] }
   0xa   :  { %151 = vmatpush.bf16.msra.mxu0 %v616_v1  ;;  %v620_v14 = vld [vmem:[%s886_s3 + $0x10] sm:$0xff]  ;;  %v619_v15 = vld [vmem:[%s886_s3 + $0x8] sm:$0xff]  ;;  %v618_v16 = vld [vmem:[%s886_s3] sm:$0xff] }
   0xb   :  { %v615_v17 = vld [vmem:[%s883_s0 + $0x38] sm:$0xff]  ;;  %v787_v19 = vld [vmem:[%s885_s2] ss:$0 sm:$0xff]  ;;  %v632_v62 = vld [vmem:[%s888_s5 + $0x30] sm:$0xff] }
   0xc   :  { %v633_v58 = vld [vmem:[%s888_s5 + $0x38] sm:$0xff]  ;;  %v631_v0 = vld [vmem:[%s888_s5 + $0x28] sm:$0xff]  ;;  %v630_v1 = vld [vmem:[%s888_s5 + $0x20] sm:$0xff] }
   0xd   :  { %536 = vmatmul.msk.bf16.vlgmr.msra.gmra.mxu0 %vm119_vm0, %v608_v2  ;;  %286 = vmatpush.bf16.msra.mxu1 %v624_v9 }
   0xe   :  { %635 = vmatpush.bf16.msra.mxu3 %v624_v9  ;;  %426 = vmatpush.bf16.msra.mxu2 %v633_v58  ;;  %v628_v9 = vld [vmem:[%s888_s5 + $0x10] sm:$0xff] }
  0x11   :  { %287 = vmatpush.bf16.msra.mxu1 %v623_v10 }
  0x12   :  { %636 = vmatpush.bf16.msra.mxu3 %v623_v10  ;;  %427 = vmatpush.bf16.msra.mxu2 %v632_v62 }
  0x15   :  { %288 = vmatpush.bf16.msra.mxu1 %v622_v11 }
  0x16   :  { %637 = vmatpush.bf16.msra.mxu3 %v622_v11  ;;  %428 = vmatpush.bf16.msra.mxu2 %v631_v0  ;;  %v627_v11 = vld [vmem:[%s888_s5 + $0x8] sm:$0xff] }
  0x19   :  { %289 = vmatpush.bf16.msra.mxu1 %v621_v12 }
  0x1a   :  { %638 = vmatpush.bf16.msra.mxu3 %v621_v12  ;;  %429 = vmatpush.bf16.msra.mxu2 %v630_v1  ;;  %v626_v12 = vld [vmem:[%s888_s5] sm:$0xff] }
  0x1d   :  { %537 = vmatmul.msk.bf16.gmra.mxu0 %vm119_vm0, %v609_v3  ;;  %290 = vmatpush.bf16.msra.mxu1 %v620_v14 }
  0x1e   :  { %639 = vmatpush.bf16.msra.mxu3 %v620_v14 }
  0x21   :  { %291 = vmatpush.bf16.msra.mxu1 %v619_v15 }
  0x22   :  { %640 = vmatpush.bf16.msra.mxu3 %v619_v15 }
  0x25   :  { %292 = vmatpush.bf16.msra.mxu1 %v618_v16 }
  0x26   :  { %641 = vmatpush.bf16.msra.mxu3 %v618_v16 }
  0x2a   :  { %642 = vmatpush.bf16.msrb.mxu3 %v633_v58 }
  0x2d   :  { %538 = vmatmul.msk.bf16.gmra.mxu0 %vm119_vm0, %v610_v4 }
  0x2e   :  { %643 = vmatpush.bf16.msrb.mxu3 %v632_v62 }
  0x32   :  { %644 = vmatpush.bf16.msrb.mxu3 %v631_v0 }
  0x36   :  { %645 = vmatpush.bf16.msrb.mxu3 %v630_v1 }
  0x3d   :  { %539 = vmatmul.msk.bf16.gmra.mxu0 %vm119_vm0, %v611_v5  ;;  %v629_v5 = vld [vmem:[%s888_s5 + $0x18] sm:$0xff] }
  0x3e   :  { %430 = vmatpush.bf16.msra.mxu2 %v629_v5  ;;  %646 = vmatpush.bf16.msrb.mxu3 %v629_v5 }
  0x42   :  { %431 = vmatpush.bf16.msra.mxu2 %v628_v9  ;;  %647 = vmatpush.bf16.msrb.mxu3 %v628_v9 }
  0x46   :  { %432 = vmatpush.bf16.msra.mxu2 %v627_v11  ;;  %648 = vmatpush.bf16.msrb.mxu3 %v627_v11 }
  0x4a   :  { %433 = vmatpush.bf16.msra.mxu2 %v626_v12  ;;  %649 = vmatpush.bf16.msrb.mxu3 %v626_v12  ;;  %v655_v12 = vld [vmem:[%s889_s6] ss:$0 sm:$0xff] }
  0x4d   :  { %540 = vmatmul.msk.bf16.gmra.mxu0 %vm119_vm0, %v612_v6 }
  0x5d   :  { %541 = vmatmul.msk.bf16.gmra.mxu0 %vm119_vm0, %v613_v8 }
  0x6d   :  { %542 = vmatmul.msk.bf16.gmra.mxu0 %vm119_vm0, %v614_v13 }
  0x7d   :  { %543 = vmatmul.msk.bf16.gmra.mxu0 %vm119_vm0, %v615_v17 }
  0x8a   :  { %v153_v18 = vpop.f32.mrf.mxu0 }
  0x8b   :  { %v154_v20 = vadd.f32 %v787_v19, %v153_v18 }
  0x8d   :  { %v193_v23 = vmax.f32 %v154_v20, 0.0 }
  0x92   :  { %v155_v21 = vpop.f32.mrf.mxu0 }
  0x93   :  { %v156_v22 = vadd.f32 %v787_v19, %v155_v21  ;;  %v654_v21 = vld [vmem:[%s887_s4] ss:$0 sm:$0xff] }
  0x95   :  { %v194_v24 = vmax.f32 %v156_v22, 0.0 }
  0x97   :  { %v209_v25 = vpack.c.bf16 %v194_v24, %v193_v23 }
  0x99   :  { %293 = vmatmul.bf16.vlgmr.msra.gmra.mxu1 %v209_v25 }
  0x9a   :  { %v158_v26 = vpop.f32.mrf.mxu0 }
  0x9b   :  { %v159_v27 = vadd.f32 %v787_v19, %v158_v26 }
  0x9d   :  { %v195_v30 = vmax.f32 %v159_v27, 0.0 }
  0xa2   :  { %v160_v28 = vpop.f32.mrf.mxu0 }
  0xa3   :  { %v161_v29 = vadd.f32 %v787_v19, %v160_v28 }
  0xa5   :  { %v196_v31 = vmax.f32 %v161_v29, 0.0 }
  0xa7   :  { %v210_v32 = vpack.c.bf16 %v196_v31, %v195_v30 }
  0xa9   :  { %298 = vmatmul.bf16.gmra.mxu1 %v210_v32 }
  0xaa   :  { %v163_v33 = vpop.f32.mrf.mxu0 }
  0xab   :  { %v164_v34 = vadd.f32 %v787_v19, %v163_v33 }
  0xad   :  { %v197_v37 = vmax.f32 %v164_v34, 0.0 }
  0xb2   :  { %v165_v35 = vpop.f32.mrf.mxu0 }
  0xb3   :  { %v166_v36 = vadd.f32 %v787_v19, %v165_v35 }
  0xb5   :  { %v198_v38 = vmax.f32 %v166_v36, 0.0 }
  0xb7   :  { %v211_v39 = vpack.c.bf16 %v198_v38, %v197_v37 }
  0xb9   :  { %303 = vmatmul.bf16.gmra.mxu1 %v211_v39 }
  0xba   :  { %v168_v40 = vpop.f32.mrf.mxu0 }
  0xbb   :  { %v169_v41 = vadd.f32 %v787_v19, %v168_v40 }
  0xbd   :  { %v199_v44 = vmax.f32 %v169_v41, 0.0 }
  0xc2   :  { %v170_v42 = vpop.f32.mrf.mxu0 }
  0xc3   :  { %v171_v43 = vadd.f32 %v787_v19, %v170_v42 }
  0xc5   :  { %v200_v45 = vmax.f32 %v171_v43, 0.0 }
  0xc7   :  { %v212_v46 = vpack.c.bf16 %v200_v45, %v199_v44 }
  0xc9   :  { %308 = vmatmul.bf16.gmra.mxu1 %v212_v46 }
  0xca   :  { %v173_v47 = vpop.f32.mrf.mxu0 }
  0xcb   :  { %v174_v48 = vadd.f32 %v787_v19, %v173_v47 }
  0xcd   :  { %v201_v51 = vmax.f32 %v174_v48, 0.0 }
  0xd2   :  { %v175_v49 = vpop.f32.mrf.mxu0 }
  0xd3   :  { %v176_v50 = vadd.f32 %v787_v19, %v175_v49 }
  0xd5   :  { %v202_v52 = vmax.f32 %v176_v50, 0.0 }
  0xd7   :  { %v213_v53 = vpack.c.bf16 %v202_v52, %v201_v51 }
  0xd9   :  { %313 = vmatmul.bf16.gmra.mxu1 %v213_v53 }
  0xda   :  { %v178_v54 = vpop.f32.mrf.mxu0 }
  0xdb   :  { %v179_v55 = vadd.f32 %v787_v19, %v178_v54 }
  0xdd   :  { %v203_v59 = vmax.f32 %v179_v55, 0.0 }
  0xe2   :  { %v180_v56 = vpop.f32.mrf.mxu0 }
  0xe3   :  { %v181_v57 = vadd.f32 %v787_v19, %v180_v56 }
  0xe5   :  { %v204_v60 = vmax.f32 %v181_v57, 0.0 }
  0xe7   :  { %v214_v61 = vpack.c.bf16 %v204_v60, %v203_v59 }
  0xe9   :  { %318 = vmatmul.bf16.gmra.mxu1 %v214_v61 }
  0xea   :  { %v183_v63 = vpop.f32.mrf.mxu0 }
  0xeb   :  { %v184_v2 = vadd.f32 %v787_v19, %v183_v63 }
  0xed   :  { %v205_v6 = vmax.f32 %v184_v2, 0.0 }
  0xf2   :  { %v185_v3 = vpop.f32.mrf.mxu0 }
  0xf3   :  { %v186_v4 = vadd.f32 %v787_v19, %v185_v3 }
  0xf5   :  { %v206_v7 = vmax.f32 %v186_v4, 0.0 }
  0xf7   :  { %v215_v8 = vpack.c.bf16 %v206_v7, %v205_v6 }
  0xf9   :  { %323 = vmatmul.bf16.vlgmr.msra.gmra.mxu3 %v215_v8 }
  0xfa   :  { %v188_v10 = vpop.f32.mrf.mxu0 }
  0xfb   :  { %v189_v13 = vadd.f32 %v787_v19, %v188_v10 }
  0xfd   :  { %v207_v16 = vmax.f32 %v189_v13, 0.0 }
 0x102   :  { %v190_v14 = vpop.f32.mrf.mxu0 }
 0x103   :  { %v191_v15 = vadd.f32 %v787_v19, %v190_v14 }
 0x105   :  { %v208_v17 = vmax.f32 %v191_v15, 0.0 }
 0x107   :  { %v216_v18 = vpack.c.bf16 %v208_v17, %v207_v16 }
 0x109   :  { %328 = vmatmul.bf16.gmra.mxu3 %v216_v18 }
 0x116   :  { %v294_v20 = vpop.f32.mrf.mxu1 }
 0x117   :  { %v295_v22 = vadd.f32 %v654_v21, %v294_v20 }
 0x119   :  { %v334_v25 = vmax.f32 %v295_v22, 0.0 }
 0x11e   :  { %v296_v23 = vpop.f32.mrf.mxu1 }
 0x11f   :  { %v297_v24 = vadd.f32 %v654_v21, %v296_v23 }
 0x121   :  { %v335_v26 = vmax.f32 %v297_v24, 0.0 }
 0x123   :  { %v350_v27 = vpack.c.bf16 %v335_v26, %v334_v25 }
 0x125   :  { %434 = vmatmul.bf16.vlgmr.msra.gmra.mxu2 %v350_v27 }
 0x126   :  { %v299_v28 = vpop.f32.mrf.mxu1 }
 0x127   :  { %v300_v29 = vadd.f32 %v654_v21, %v299_v28 }
 0x129   :  { %v336_v31 = vmax.f32 %v300_v29, 0.0 }
 0x12e   :  { %v301_v30 = vpop.f32.mrf.mxu1 }
 0x12f   :  { %v302_v19 = vadd.f32 %v654_v21, %v301_v30 }
 0x131   :  { %v337_v32 = vmax.f32 %v302_v19, 0.0 }
 0x133   :  { %v351_v33 = vpack.c.bf16 %v337_v32, %v336_v31 }
 0x135   :  { %439 = vmatmul.bf16.gmra.mxu2 %v351_v33 }
 0x136   :  { %v304_v34 = vpop.f32.mrf.mxu1 }
 0x137   :  { %v305_v35 = vadd.f32 %v654_v21, %v304_v34 }
 0x139   :  { %v338_v38 = vmax.f32 %v305_v35, 0.0 }
 0x13e   :  { %v306_v36 = vpop.f32.mrf.mxu1 }
 0x13f   :  { %v307_v37 = vadd.f32 %v654_v21, %v306_v36 }
 0x141   :  { %v339_v39 = vmax.f32 %v307_v37, 0.0 }
 0x143   :  { %v352_v40 = vpack.c.bf16 %v339_v39, %v338_v38 }
 0x145   :  { %444 = vmatmul.bf16.gmra.mxu2 %v352_v40 }
 0x146   :  { %v309_v41 = vpop.f32.mrf.mxu1 }
 0x147   :  { %v310_v42 = vadd.f32 %v654_v21, %v309_v41 }
 0x149   :  { %v340_v45 = vmax.f32 %v310_v42, 0.0 }
 0x14e   :  { %v311_v43 = vpop.f32.mrf.mxu1 }
 0x14f   :  { %v312_v44 = vadd.f32 %v654_v21, %v311_v43 }
 0x151   :  { %v341_v46 = vmax.f32 %v312_v44, 0.0 }
 0x153   :  { %v353_v47 = vpack.c.bf16 %v341_v46, %v340_v45 }
 0x155   :  { %449 = vmatmul.bf16.gmra.mxu2 %v353_v47 }
 0x156   :  { %v314_v48 = vpop.f32.mrf.mxu1 }
 0x157   :  { %v315_v49 = vadd.f32 %v654_v21, %v314_v48 }
 0x159   :  { %v342_v52 = vmax.f32 %v315_v49, 0.0 }
 0x15e   :  { %v316_v50 = vpop.f32.mrf.mxu1 }
 0x15f   :  { %v317_v51 = vadd.f32 %v654_v21, %v316_v50 }
 0x161   :  { %v343_v53 = vmax.f32 %v317_v51, 0.0 }
 0x163   :  { %v354_v54 = vpack.c.bf16 %v343_v53, %v342_v52 }
 0x165   :  { %454 = vmatmul.bf16.gmra.mxu2 %v354_v54 }
 0x166   :  { %v319_v55 = vpop.f32.mrf.mxu1 }
 0x167   :  { %v320_v56 = vadd.f32 %v654_v21, %v319_v55 }
 0x169   :  { %v344_v59 = vmax.f32 %v320_v56, 0.0 }
 0x16e   :  { %v321_v57 = vpop.f32.mrf.mxu1 }
 0x16f   :  { %v322_v58 = vadd.f32 %v654_v21, %v321_v57 }
 0x171   :  { %v345_v60 = vmax.f32 %v322_v58, 0.0 }
 0x173   :  { %v355_v61 = vpack.c.bf16 %v345_v60, %v344_v59 }
 0x175   :  { %459 = vmatmul.bf16.gmra.mxu2 %v355_v61 }
 0x17c   :  { %v324_v62 = vpop.f32.mrf.mxu3 }
 0x17d   :  { %v325_v63 = vadd.f32 %v654_v21, %v324_v62 }
 0x17f   :  { %v346_v2 = vmax.f32 %v325_v63, 0.0 }
 0x184   :  { %v326_v0 = vpop.f32.mrf.mxu3 }
 0x185   :  { %v327_v1 = vadd.f32 %v654_v21, %v326_v0 }
 0x187   :  { %v347_v3 = vmax.f32 %v327_v1, 0.0 }
 0x189   :  { %v356_v4 = vpack.c.bf16 %v347_v3, %v346_v2 }
 0x18b   :  { %464 = vmatmul.bf16.vlgmr.msrb.gmra.mxu3 %v356_v4 }
 0x18c   :  { %v329_v5 = vpop.f32.mrf.mxu3 }
 0x18d   :  { %v330_v6 = vadd.f32 %v654_v21, %v329_v5 }
 0x18f   :  { %v348_v9 = vmax.f32 %v330_v6, 0.0 }
 0x194   :  { %v331_v7 = vpop.f32.mrf.mxu3 }
 0x195   :  { %v332_v8 = vadd.f32 %v654_v21, %v331_v7 }
 0x197   :  { %v349_v10 = vmax.f32 %v332_v8, 0.0 }
 0x199   :  { %v357_v11 = vpack.c.bf16 %v349_v10, %v348_v9 }
 0x19b   :  { %469 = vmatmul.bf16.gmra.mxu3 %v357_v11 }
 0x1a8   :  { %v435_v13 = vpop.f32.mrf.mxu2 }
 0x1a9   :  { %v436_v14 = vadd.f32 %v655_v12, %v435_v13 }
 0x1ab   :  { %475 = vst [vmem:[%s890_s7] sm:$0xff] %v436_v14 }
 0x1b0   :  { %v437_v15 = vpop.f32.mrf.mxu2 }
 0x1b1   :  { %v438_v16 = vadd.f32 %v655_v12, %v437_v15 }
 0x1b3   :  { %476 = vst [vmem:[%s890_s7 + $0x8] sm:$0xff] %v438_v16 }
 0x1b8   :  { %v440_v17 = vpop.f32.mrf.mxu2 }
 0x1b9   :  { %v441_v18 = vadd.f32 %v655_v12, %v440_v17 }
 0x1bb   :  { %477 = vst [vmem:[%s890_s7 + $0x10] sm:$0xff] %v441_v18 }
 0x1c0   :  { %v442_v20 = vpop.f32.mrf.mxu2 }
 0x1c1   :  { %v443_v21 = vadd.f32 %v655_v12, %v442_v20 }
 0x1c3   :  { %478 = vst [vmem:[%s890_s7 + $0x18] sm:$0xff] %v443_v21 }
 0x1c8   :  { %v445_v22 = vpop.f32.mrf.mxu2 }
 0x1c9   :  { %v446_v23 = vadd.f32 %v655_v12, %v445_v22 }
 0x1cb   :  { %479 = vst [vmem:[%s890_s7 + $0x20] sm:$0xff] %v446_v23 }
 0x1d0   :  { %v447_v24 = vpop.f32.mrf.mxu2 }
 0x1d1   :  { %v448_v25 = vadd.f32 %v655_v12, %v447_v24 }
 0x1d3   :  { %480 = vst [vmem:[%s890_s7 + $0x28] sm:$0xff] %v448_v25 }
 0x1d8   :  { %v450_v26 = vpop.f32.mrf.mxu2 }
 0x1d9   :  { %v451_v27 = vadd.f32 %v655_v12, %v450_v26 }
 0x1db   :  { %481 = vst [vmem:[%s890_s7 + $0x30] sm:$0xff] %v451_v27 }
 0x1e0   :  { %v452_v28 = vpop.f32.mrf.mxu2 }
 0x1e1   :  { %v453_v29 = vadd.f32 %v655_v12, %v452_v28 }
 0x1e3   :  { %482 = vst [vmem:[%s890_s7 + $0x38] sm:$0xff] %v453_v29 }
 0x1e8   :  { %v455_v30 = vpop.f32.mrf.mxu2 }
 0x1e9   :  { %v456_v19 = vadd.f32 %v655_v12, %v455_v30 }
 0x1eb   :  { %483 = vst [vmem:[%s890_s7 + $0x40] sm:$0xff] %v456_v19 }
 0x1f0   :  { %v457_v31 = vpop.f32.mrf.mxu2 }
 0x1f1   :  { %v458_v32 = vadd.f32 %v655_v12, %v457_v31 }
 0x1f3   :  { %484 = vst [vmem:[%s890_s7 + $0x48] sm:$0xff] %v458_v32 }
 0x1f8   :  { %v460_v33 = vpop.f32.mrf.mxu2 }
 0x1f9   :  { %v461_v34 = vadd.f32 %v655_v12, %v460_v33 }
 0x1fb   :  { %485 = vst [vmem:[%s890_s7 + $0x50] sm:$0xff] %v461_v34 }
 0x200   :  { %v462_v35 = vpop.f32.mrf.mxu2 }
 0x201   :  { %v463_v36 = vadd.f32 %v655_v12, %v462_v35 }
 0x203   :  { %486 = vst [vmem:[%s890_s7 + $0x58] sm:$0xff] %v463_v36 }
 0x20e   :  { %v465_v37 = vpop.f32.mrf.mxu3 }
 0x20f   :  { %v466_v38 = vadd.f32 %v655_v12, %v465_v37 }
 0x211   :  { %487 = vst [vmem:[%s890_s7 + $0x60] sm:$0xff] %v466_v38 }
 0x216   :  { %v467_v39 = vpop.f32.mrf.mxu3 }
 0x217   :  { %v468_v40 = vadd.f32 %v655_v12, %v467_v39 }
 0x219   :  { %488 = vst [vmem:[%s890_s7 + $0x68] sm:$0xff] %v468_v40 }
 0x21e   :  { %v470_v41 = vpop.f32.mrf.mxu3 }
 0x21f   :  { %v471_v42 = vadd.f32 %v655_v12, %v470_v41 }
 0x221   :  { %489 = vst [vmem:[%s890_s7 + $0x70] sm:$0xff] %v471_v42 }
 0x226   :  { %v472_v43 = vpop.f32.mrf.mxu3 }
 0x227   :  { %v473_v44 = vadd.f32 %v655_v12, %v472_v43 }
 0x229   :  { %490 = vst [vmem:[%s890_s7 + $0x78] sm:$0xff] %v473_v44 }
 0x22a   :  { %495 = vsyncpa [#allocation3], 1 }

</bundles_post_ra>
